<compile_context>
chip_gen: v7x
topology: tpu7x:2x2x1
jax: 0.10.0
libtpu: 0.0.40
codegen_flags: <defaults>
</compile_context>

<pallas_src>
import functools
import math

import jax
import jax.numpy as jnp
from jax import lax
from jax.experimental import pallas as pl
from jax.experimental.pallas import tpu as pltpu


def _round_up(x, m):
    return (x + m - 1) // m * m


def _pad_channels(c):
    # bf16 sublane tile is 16; for production-sized C fill the MXU (128/256).
    if c >= 96:
        return _round_up(c, 128)
    return _round_up(c, 16)


def _vmem_limit_bytes():
    """Per-generation VMEM budget: 3/4 of physical, capped at 96 MiB."""
    try:
        cap = int(pltpu.get_tpu_info().vmem_capacity_bytes)
    except Exception:
        return 48 * 1024 * 1024          # safe ceiling on every generation
    return max(32 * 1024 * 1024, min(3 * cap // 4, 96 * 1024 * 1024))


def _choose_tn(n, cp, vmem_limit):
    """Largest N tile (divisor of N, lane-dense multiple of 128) in budget."""
    budget = max(vmem_limit - 4 * 1024 * 1024, 1 * 1024 * 1024)

    def fits(tn):
        # ~12 live f32 (cp, tn) slabs: double-buffered in/out blocks + kernel temps.
        return 12 * cp * tn * 4 <= budget

    if fits(n):
        return n
    best = None
    for tn in range(128, n, 128):
        if n % tn == 0 and fits(tn):
            best = tn
    if best is not None:
        return best
    # TODO(synk): masked tail tiles for N not divisible by a fitting tile size.
    return n


# ---------------------------------------------------------------------------
# Pass 1: accumulate kv (Cp, Cp) and the k2 column norm over all N tiles.
# ---------------------------------------------------------------------------
def _pass1_kernel(*refs, cp, nt, inv_sqrt_n, fold_bias):
    if fold_bias:
        x_ref, wkv_ref, kv_out_ref, kv_acc, knorm_acc = refs
        bkv_ref = None
    else:
        x_ref, wkv_ref, bkv_ref, kv_out_ref, kv_acc, knorm_acc = refs

    t = pl.program_id(1)

    @pl.when(t == 0)
    def _():
        kv_acc[...] = jnp.zeros_like(kv_acc)
        knorm_acc[...] = jnp.zeros_like(knorm_acc)

    # k/v projection: bf16 in, f32 accumulation.  Contracting dim 0 of the
    # small (Cp, 2Cp) weight keeps any relayout off the big (Cp, TN) slab.
    x_bf = x_ref[0].astype(jnp.bfloat16)                       # (Cp, TN)
    proj = lax.dot_general(
        wkv_ref[...], x_bf,
        dimension_numbers=(((0,), (0,)), ((), ())),
        preferred_element_type=jnp.float32)                    # (2Cp, TN)
    if not fold_bias:
        proj = proj + bkv_ref[...]

    k = proj[0:cp]                                             # mean-centered
    v = proj[cp:2 * cp]

    k2 = k * k
    k2s = jnp.sum(k2, axis=0, keepdims=True)                   # (1, TN)
    k2n = k2 * pl.reciprocal(k2s + 1e-7, approx=True)          # (Cp, TN)

    knorm_acc[...] += jnp.sum(k2n * k2n, axis=1, keepdims=True)    # (Cp, 1)
    # kv[c, c'] = sum_n k2n[c, n] * v[c', n]  (contract the lane axis)
    kv_acc[...] += lax.dot_general(
        k2n.astype(jnp.bfloat16), v.astype(jnp.bfloat16),
        dimension_numbers=(((1,), (1,)), ((), ())),
        preferred_element_type=jnp.float32)                    # (Cp, Cp)

    @pl.when(t == nt - 1)
    def _():
        nrm = knorm_acc[...]
        s_k = jnp.where(nrm > 0.0, lax.rsqrt(nrm), 0.0)        # (Cp, 1)
        kv_out_ref[0] = (kv_acc[...] * (s_k * inv_sqrt_n)).astype(kv_out_ref.dtype)


# ---------------------------------------------------------------------------
# Pass 2: per N tile, recompute q/v, apply kv, output projection.
# ---------------------------------------------------------------------------
def _pass2_kernel(*refs, cp, fold_bias):
    if fold_bias:
        x_ref, wqv_ref, kv_ref, wln_ref, bln_ref, o_ref = refs
        bqv_ref = None
    else:
        x_ref, wqv_ref, bqv_ref, kv_ref, wln_ref, bln_ref, o_ref = refs

    x_bf = x_ref[0].astype(jnp.bfloat16)                       # (Cp, TN)
    proj = lax.dot_general(
        wqv_ref[...], x_bf,
        dimension_numbers=(((0,), (0,)), ((), ())),
        preferred_element_type=jnp.float32)                    # (2Cp, TN)
    if not fold_bias:
        proj = proj + bqv_ref[...]

    q = proj[0:cp]                                             # mean-centered
    v = proj[cp:2 * cp]

    q2 = q * q
    q2s = jnp.sum(q2, axis=0, keepdims=True)                   # (1, TN)
    q2n = q2 * pl.reciprocal(q2s + 1e-7, approx=True)          # (Cp, TN)
    qn = jnp.sum(q2n * q2n, axis=0, keepdims=True)             # (1, TN)
    s_q = jnp.where(qn > 0.0, lax.rsqrt(qn), 0.0)

    # t2[c', n] = sum_c kv[c, c'] * q2n[c, n]; transpose (if any) stays on the
    # small (Cp, Cp) kv operand.
    t2 = lax.dot_general(
        kv_ref[0], q2n.astype(jnp.bfloat16),
        dimension_numbers=(((0,), (0,)), ((), ())),
        preferred_element_type=jnp.float32)                    # (Cp, TN)

    attn = v + t2 * s_q                                        # single fused pass

    out = lax.dot_general(
        wln_ref[...], attn.astype(jnp.bfloat16),
        dimension_numbers=(((0,), (0,)), ((), ())),
        preferred_element_type=jnp.float32)                    # (Cp, TN)
    o_ref[0] = (out + bln_ref[...]).astype(o_ref.dtype)


# ---------------------------------------------------------------------------
# Host-side weight preparation.
# ---------------------------------------------------------------------------
def _prepare_kernel_params(params, c, cp, fold_bias):
    wq, wk, wv = params["wq"], params["wk"], params["wv"]      # (C, C) = (in, out)
    bq, bk, bv = params["bq"], params["bk"], params["bv"]      # (1, C)
    wln, bln = params["wln"], params["bln"]

    # Fold the per-token channel-mean subtraction of q/k into weights/biases:
    #   q - mean_c(q) == x @ (Wq - rowmean(Wq)) + (bq - mean(bq))
    wq = wq - jnp.mean(wq, axis=1, keepdims=True)
    wk = wk - jnp.mean(wk, axis=1, keepdims=True)
    bq = bq - jnp.mean(bq, axis=1, keepdims=True)
    bk = bk - jnp.mean(bk, axis=1, keepdims=True)

    pad = cp - c

    def pad_w(wm, bias_row=None):
        wm = jnp.pad(wm, ((0, pad), (0, pad)))
        if bias_row is not None:
            # x carries a constant 1.0 in padded input channel `c`; placing the
            # bias there folds the bias add into the projection matmul.
            wm = wm.at[c, :c].set(bias_row[0])
        return wm

    def pad_b(bm):
        return jnp.pad(bm[0], ((0, pad),))

    if fold_bias:
        wkv = jnp.concatenate([pad_w(wk, bk), pad_w(wv, bv)], axis=1)   # (Cp, 2Cp)
        wqv = jnp.concatenate([pad_w(wq, bq), pad_w(wv, bv)], axis=1)   # (Cp, 2Cp)
        bkv = bqv = None
    else:
        wkv = jnp.concatenate([pad_w(wk), pad_w(wv)], axis=1)
        wqv = jnp.concatenate([pad_w(wq), pad_w(wv)], axis=1)
        bkv = jnp.concatenate([pad_b(bk), pad_b(bv)]).reshape(2 * cp, 1).astype(jnp.float32)
        bqv = jnp.concatenate([pad_b(bq), pad_b(bv)]).reshape(2 * cp, 1).astype(jnp.float32)

    wln_p = pad_w(wln)                                                  # (Cp, Cp)
    bln_p = pad_b(bln).reshape(cp, 1).astype(jnp.float32)

    return (wkv.astype(jnp.bfloat16), wqv.astype(jnp.bfloat16),
            wln_p.astype(jnp.bfloat16), bln_p, bkv, bqv)


# ---------------------------------------------------------------------------
# Forward.
# ---------------------------------------------------------------------------
def essattn_forward(x_nchw, params):
    """x_nchw: (B, C, H, W) float32.  params: dict of pre-transposed weights."""
    b, c, h, w = x_nchw.shape
    n = h * w
    cp = _pad_channels(c)
    fold_bias = cp > c

    vmem_limit = _vmem_limit_bytes()
    tn = _choose_tn(n, cp, vmem_limit)
    nt = n // tn

    # NCHW -> (B, Cp, N): pure reshape + channel pad; N is the lane axis.
    x_bcn = x_nchw.reshape(b, c, n)
    if cp > c:
        x_bcn = jnp.concatenate(
            [x_bcn,
             jnp.ones((b, 1, n), x_bcn.dtype),                 # bias channel
             jnp.zeros((b, cp - c - 1, n), x_bcn.dtype)],
            axis=1)

    wkv, wqv, wln_p, bln_p, bkv, bqv = _prepare_kernel_params(params, c, cp, fold_bias)

    # ---- Pass 1: kv accumulation over N tiles -----------------------------
    in_specs1 = [
        pl.BlockSpec((1, cp, tn), lambda i, t: (i, 0, t)),     # x tile
        pl.BlockSpec((cp, 2 * cp), lambda i, t: (0, 0)),       # Wk|Wv (bf16)
    ]
    args1 = [x_bcn, wkv]
    if not fold_bias:
        in_specs1.append(pl.BlockSpec((2 * cp, 1), lambda i, t: (0, 0)))
        args1.append(bkv)

    kv = pl.pallas_call(
        functools.partial(_pass1_kernel, cp=cp, nt=nt,
                          inv_sqrt_n=1.0 / math.sqrt(n), fold_bias=fold_bias),
        out_shape=jax.ShapeDtypeStruct((b, cp, cp), jnp.bfloat16),
        grid_spec=pltpu.PrefetchScalarGridSpec(
            num_scalar_prefetch=0,
            grid=(b, nt),
            in_specs=in_specs1,
            out_specs=pl.BlockSpec((1, cp, cp), lambda i, t: (i, 0, 0)),
            scratch_shapes=[pltpu.VMEM((cp, cp), jnp.float32),
                            pltpu.VMEM((cp, 1), jnp.float32)],
        ),
        compiler_params=pltpu.CompilerParams(
            dimension_semantics=("parallel", "arbitrary"),
            vmem_limit_bytes=vmem_limit),
    )(*args1)

    # ---- Pass 2: emit output tiles (fully parallel grid) -------------------
    in_specs2 = [
        pl.BlockSpec((1, cp, tn), lambda i, t: (i, 0, t)),     # x tile
        pl.BlockSpec((cp, 2 * cp), lambda i, t: (0, 0)),       # Wq|Wv (bf16)
    ]
    args2 = [x_bcn, wqv]
    if not fold_bias:
        in_specs2.append(pl.BlockSpec((2 * cp, 1), lambda i, t: (0, 0)))
        args2.append(bqv)
    in_specs2 += [
        pl.BlockSpec((1, cp, cp), lambda i, t: (i, 0, 0)),     # kv (bf16)
        pl.BlockSpec((cp, cp), lambda i, t: (0, 0)),           # Wln (bf16)
        pl.BlockSpec((cp, 1), lambda i, t: (0, 0)),            # bln (f32)
    ]
    args2 += [kv, wln_p, bln_p]

    out_bcn = pl.pallas_call(
        functools.partial(_pass2_kernel, cp=cp, fold_bias=fold_bias),
        out_shape=jax.ShapeDtypeStruct((b, cp, n), x_nchw.dtype),
        grid_spec=pltpu.PrefetchScalarGridSpec(
            num_scalar_prefetch=0,
            grid=(b, nt),
            in_specs=in_specs2,
            out_specs=pl.BlockSpec((1, cp, tn), lambda i, t: (i, 0, t)),
        ),
        compiler_params=pltpu.CompilerParams(
            dimension_semantics=("parallel", "parallel"),
            vmem_limit_bytes=vmem_limit),
    )(*args2)

    # Drop channel padding; (B, C, N) -> NCHW is a free reshape.
    return out_bcn[:, :c, :].reshape(b, c, h, w)


# ---------------------------------------------------------------------------
# Init + pure-JAX reference (matches the PyTorch module semantics).
# ---------------------------------------------------------------------------
def _init_params(key, dim):
    """Deterministic init mimicking nn.Linear's uniform(-1/sqrt(fan_in), ...)."""
    ks = jax.random.split(key, 4)
    bound = 1.0 / math.sqrt(dim)
    wqkv_t = jax.random.uniform(ks[0], (dim, 3 * dim), jnp.float32, -bound, bound)
    bqkv = jax.random.uniform(ks[1], (1, 3 * dim), jnp.float32, -bound, bound)
    wln_t = jax.random.uniform(ks[2], (dim, dim), jnp.float32, -bound, bound)
    bln = jax.random.uniform(ks[3], (1, dim), jnp.float32, -bound, bound)
    return {
        "wq": wqkv_t[:, 0 * dim:1 * dim],
        "wk": wqkv_t[:, 1 * dim:2 * dim],
        "wv": wqkv_t[:, 2 * dim:3 * dim],
        "bq": bqkv[:, 0 * dim:1 * dim],
        "bk": bqkv[:, 1 * dim:2 * dim],
        "bv": bqkv[:, 2 * dim:3 * dim],
        "wln": wln_t,
        "bln": bln,
    }


def _reference_forward(x_nchw, params):
    b, c, h, w = x_nchw.shape
    n = h * w
    x = jnp.transpose(x_nchw.reshape(b, c, n), (0, 2, 1))          # (B, N, C)
    q = x @ params["wq"] + params["bq"]
    k = x @ params["wk"] + params["bk"]
    v = x @ params["wv"] + params["bv"]
    q = q - jnp.mean(q, axis=2, keepdims=True)
    k = k - jnp.mean(k, axis=2, keepdims=True)
    q2 = q ** 2
    q2s = jnp.sum(q2, axis=2, keepdims=True)
    k2 = k ** 2
    k2s = jnp.sum(k2, axis=2, keepdims=True)
    k2 = k2 / (k2s + 1e-7)
    k2 = k2 / jnp.maximum(jnp.linalg.norm(k2, axis=-2, keepdims=True), 1e-12)
    q2 = q2 / (q2s + 1e-7)
    q2 = q2 / jnp.maximum(jnp.linalg.norm(q2, axis=-1, keepdims=True), 1e-12)
    t2 = q2 @ (jnp.swapaxes(k2, -2, -1) @ v) / math.sqrt(n)
    attn = v + t2
    out = attn @ params["wln"] + params["bln"]
    return jnp.transpose(out.reshape(b, h, w, c), (0, 3, 1, 2))


if __name__ == "__main__":
    key = jax.random.PRNGKey(0)
    k_x, k_p = jax.random.split(key)

    B, C, H, W = 2, 4, 16, 16
    x = jax.random.normal(k_x, (B, C, H, W), jnp.float32)
    params = _init_params(k_p, C)

    out = jax.block_until_ready(essattn_forward(x, params))
    ref = _reference_forward(x, params)

    assert out.shape == (B, C, H, W)
    # Relaxed tolerance: the kernel feeds the MXU bf16 (f32 accumulation) and
    # uses the EUP approximate reciprocal.
    assert jnp.allclose(out, ref, atol=5e-2, rtol=5e-2), "mismatch vs reference"

    print("KERNEL_OK")
</pallas_src>

<mosaic_0001>
module attributes {stable_mosaic.version = 11 : i64} {
  func.func @_pass1_kernel(%arg0: i32, %arg1: i32, %arg2: memref<1x16x256xf32, #tpu.memory_space<vmem>>, %arg3: memref<16x32xbf16, #tpu.memory_space<vmem>>, %arg4: memref<1x16x16xbf16, #tpu.memory_space<vmem>>, %arg5: memref<16x16xf32, #tpu.memory_space<vmem>>, %arg6: memref<16x1xf32, #tpu.memory_space<vmem>>) attributes {dimension_semantics = [#tpu.dimension_semantics<parallel>, #tpu.dimension_semantics<arbitrary>], iteration_bounds = array<i64: 2, 1>, scalar_prefetch = 0 : i64, scratch_operands = 2 : i64, tpu.core_type = #tpu.core_type<tc>, window_params = [{transform_indices = @transform_0, window_bounds = array<i64: 1, 16, 256>}, {pipeline_mode = #tpu.pipeline_mode<synchronous>, transform_indices = @transform_1, window_bounds = array<i64: 16, 32>}, {transform_indices = @transform_2, window_bounds = array<i64: 1, 16, 16>}]} {
    %c0_i32 = arith.constant 0 : i32
    %0 = arith.cmpi eq, %arg1, %c0_i32 : i32
    %1 = arith.extui %0 : i1 to i32
    %c0_i32_0 = arith.constant 0 : i32
    %2 = arith.cmpi ne, %1, %c0_i32_0 : i32
    scf.if %2 {
      %cst_19 = arith.constant 0.000000e+00 : f32
      %33 = vector.broadcast %cst_19 : f32 to vector<16x16xf32>
      %c0_20 = arith.constant 0 : index
      %c0_21 = arith.constant 0 : index
      %34 = vector.load %arg5[%c0_20, %c0_21] : memref<16x16xf32, #tpu.memory_space<vmem>>, vector<16x16xf32>
      tpu.vector_store %arg5[%c0_20, %c0_21], %33 {strides = array<i32>} : memref<16x16xf32, #tpu.memory_space<vmem>>, vector<16x16xf32>,
      %cst_22 = arith.constant 0.000000e+00 : f32
      %35 = vector.broadcast %cst_22 : f32 to vector<16x1xf32>
      %c0_23 = arith.constant 0 : index
      %c0_24 = arith.constant 0 : index
      %36 = vector.load %arg6[%c0_23, %c0_24] : memref<16x1xf32, #tpu.memory_space<vmem>>, vector<16x1xf32>
      tpu.vector_store %arg6[%c0_23, %c0_24], %35 {strides = array<i32>} : memref<16x1xf32, #tpu.memory_space<vmem>>, vector<16x1xf32>,
    } else {
    }
    %c0 = arith.constant 0 : index
    %c0_1 = arith.constant 0 : index
    %c0_2 = arith.constant 0 : index
    %3 = vector.load %arg2[%c0, %c0_1, %c0_2] : memref<1x16x256xf32, #tpu.memory_space<vmem>>, vector<1x16x256xf32>
    %4 = vector.shape_cast %3 : vector<1x16x256xf32> to vector<16x256xf32>
    %5 = arith.truncf %4 : vector<16x256xf32> to vector<16x256xbf16>
    %c0_3 = arith.constant 0 : index
    %c0_4 = arith.constant 0 : index
    %6 = vector.load %arg3[%c0_3, %c0_4] : memref<16x32xbf16, #tpu.memory_space<vmem>>, vector<16x32xbf16>
    %cst = arith.constant dense<0.000000e+00> : vector<32x256xf32>
    %7 = tpu.matmul %6, %5, %cst {dimension_numbers = #tpu.dot_dimension_numbers<[0], [0], [1], [1], [0, 1, 1, 1], [], []>} : vector<16x32xbf16>, vector<16x256xbf16>, vector<32x256xf32> -> vector<32x256xf32>
    %8 = vector.extract_strided_slice %7 {offsets = [0, 0], sizes = [16, 256], strides = [1, 1]} : vector<32x256xf32> to vector<16x256xf32>
    %9 = vector.extract_strided_slice %7 {offsets = [16, 0], sizes = [16, 256], strides = [1, 1]} : vector<32x256xf32> to vector<16x256xf32>
    %10 = arith.mulf %8, %8 : vector<16x256xf32>
    %cst_5 = arith.constant dense<0.000000e+00> : vector<256xf32>
    %11 = vector.multi_reduction <add>, %10, %cst_5 [0] : vector<16x256xf32> to vector<256xf32>
    %12 = vector.shape_cast %11 : vector<256xf32> to vector<1x256xf32>
    %cst_6 = arith.constant 1.000000e-07 : f32
    %13 = vector.broadcast %cst_6 : f32 to vector<1x256xf32>
    %14 = arith.addf %12, %13 : vector<1x256xf32>
    %15 = tpu.reciprocal %14 {approx = true} : vector<1x256xf32> -> vector<1x256xf32>
    %16 = vector.broadcast %15 : vector<1x256xf32> to vector<16x256xf32>
    %17 = arith.mulf %10, %16 : vector<16x256xf32>
    %c0_7 = arith.constant 0 : index
    %c0_8 = arith.constant 0 : index
    %18 = vector.load %arg6[%c0_7, %c0_8] : memref<16x1xf32, #tpu.memory_space<vmem>>, vector<16x1xf32>
    %19 = arith.mulf %17, %17 : vector<16x256xf32>
    %cst_9 = arith.constant dense<0.000000e+00> : vector<16xf32>
    %20 = vector.multi_reduction <add>, %19, %cst_9 [1] : vector<16x256xf32> to vector<16xf32>
    %21 = vector.shape_cast %20 : vector<16xf32> to vector<16x1xf32>
    %22 = arith.addf %18, %21 : vector<16x1xf32>
    %c0_10 = arith.constant 0 : index
    %c0_11 = arith.constant 0 : index
    %23 = vector.load %arg6[%c0_10, %c0_11] : memref<16x1xf32, #tpu.memory_space<vmem>>, vector<16x1xf32>
    tpu.vector_store %arg6[%c0_10, %c0_11], %22 {strides = array<i32>} : memref<16x1xf32, #tpu.memory_space<vmem>>, vector<16x1xf32>,
    %c0_12 = arith.constant 0 : index
    %c0_13 = arith.constant 0 : index
    %24 = vector.load %arg5[%c0_12, %c0_13] : memref<16x16xf32, #tpu.memory_space<vmem>>, vector<16x16xf32>
    %25 = arith.truncf %17 : vector<16x256xf32> to vector<16x256xbf16>
    %26 = arith.truncf %9 : vector<16x256xf32> to vector<16x256xbf16>
    %cst_14 = arith.constant dense<0.000000e+00> : vector<16x16xf32>
    %27 = tpu.matmul %25, %26, %cst_14 {dimension_numbers = #tpu.dot_dimension_numbers<[1], [1], [0], [0], [0, 0, 1, 0], [], []>} : vector<16x256xbf16>, vector<16x256xbf16>, vector<16x16xf32> -> vector<16x16xf32>
    %28 = arith.addf %24, %27 : vector<16x16xf32>
    %c0_15 = arith.constant 0 : index
    %c0_16 = arith.constant 0 : index
    %29 = vector.load %arg5[%c0_15, %c0_16] : memref<16x16xf32, #tpu.memory_space<vmem>>, vector<16x16xf32>
    tpu.vector_store %arg5[%c0_15, %c0_16], %28 {strides = array<i32>} : memref<16x16xf32, #tpu.memory_space<vmem>>, vector<16x16xf32>,
    %c0_i32_17 = arith.constant 0 : i32
    %30 = arith.cmpi eq, %arg1, %c0_i32_17 : i32
    %31 = arith.extui %30 : i1 to i32
    %c0_i32_18 = arith.constant 0 : i32
    %32 = arith.cmpi ne, %31, %c0_i32_18 : i32
    scf.if %32 {
      %c0_19 = arith.constant 0 : index
      %c0_20 = arith.constant 0 : index
      %33 = vector.load %arg6[%c0_19, %c0_20] : memref<16x1xf32, #tpu.memory_space<vmem>>, vector<16x1xf32>
      %cst_21 = arith.constant 0.000000e+00 : f32
      %34 = vector.broadcast %cst_21 : f32 to vector<16x1xf32>
      %35 = arith.cmpf ogt, %33, %34 : vector<16x1xf32>
      %36 = math.rsqrt %33 : vector<16x1xf32>
      %cst_22 = arith.constant 0.000000e+00 : f32
      %37 = vector.broadcast %cst_22 : f32 to vector<16x1xf32>
      %38 = arith.select %35, %36, %37 : vector<16x1xi1>, vector<16x1xf32>
      %c0_23 = arith.constant 0 : index
      %c0_24 = arith.constant 0 : index
      %39 = vector.load %arg5[%c0_23, %c0_24] : memref<16x16xf32, #tpu.memory_space<vmem>>, vector<16x16xf32>
      %cst_25 = arith.constant 6.250000e-02 : f32
      %40 = vector.broadcast %cst_25 : f32 to vector<16x1xf32>
      %41 = arith.mulf %38, %40 : vector<16x1xf32>
      %42 = vector.broadcast %41 : vector<16x1xf32> to vector<16x16xf32>
      %43 = arith.mulf %39, %42 : vector<16x16xf32>
      %44 = arith.truncf %43 : vector<16x16xf32> to vector<16x16xbf16>
      %c0_26 = arith.constant 0 : index
      %c0_27 = arith.constant 0 : index
      %c0_28 = arith.constant 0 : index
      %45 = vector.load %arg4[%c0_26, %c0_27, %c0_28] : memref<1x16x16xbf16, #tpu.memory_space<vmem>>, vector<1x16x16xbf16>
      %46 = vector.shape_cast %45 : vector<1x16x16xbf16> to vector<16x16xbf16>
      %47 = vector.shape_cast %44 : vector<16x16xbf16> to vector<1x16x16xbf16>
      tpu.vector_store %arg4[%c0_26, %c0_27, %c0_28], %47 {strides = array<i32>} : memref<1x16x16xbf16, #tpu.memory_space<vmem>>, vector<1x16x16xbf16>,
    } else {
    }
    return
  }
  func.func @transform_0(%arg0: i32, %arg1: i32) -> (i32, i32, i32) {
    %c0_i32 = arith.constant 0 : i32
    %c0_i32_0 = arith.constant 0 : i32
    return %arg0, %c0_i32, %arg1 : i32, i32, i32
  }
  func.func @transform_1(%arg0: i32, %arg1: i32) -> (i32, i32) {
    %c0_i32 = arith.constant 0 : i32
    %c0_i32_0 = arith.constant 0 : i32
    %c0_i32_1 = arith.constant 0 : i32
    return %c0_i32, %c0_i32_0 : i32, i32
  }
  func.func @transform_2(%arg0: i32, %arg1: i32) -> (i32, i32, i32) {
    %c0_i32 = arith.constant 0 : i32
    %c0_i32_0 = arith.constant 0 : i32
    %c0_i32_1 = arith.constant 0 : i32
    return %arg0, %c0_i32, %c0_i32_0 : i32, i32, i32
  }
}

</mosaic_0001>

<bundles_post_ra>
// kernel: tpu_custom_call.1
= control target key start
LH: loop header
LB: loop body
LE: loop exit
PB: predicated region body
PF: predicated region fallthrough
CT: control target
= control target key end

     0   :  { %7 = vsyncpa [#allocation5], 0  ;;  %s1055_s0 = inlined_call_operand.hbm [shape: f32[2,16,256], index: 0, kind: input, shape index: {}]   ;;  %s1056_s1 = inlined_call_operand.hbm [shape: bf16[16,32], index: 1, kind: input, shape index: {}]   ;;  %s1057_s2 = inlined_call_operand.hbm [shape: bf16[2,16,16], index: 2, kind: output, shape index: {}]  }
   0x1   :  { %9 = vsyncpa [#allocation5 + $0x1], 0 }
   0x2   :  { %10 = vsyncpa [#allocation8], 0 }
   0x3   :  { %11 = vsyncpa [#allocation6], 0 }
   0x4   :  { %13 = vsyncpa [#allocation6 + $0x1], 0  ;;  %s825_s9 = smov 0   ;;  %s827_s10 = smov 0  }
   0x5   :  { %s829_s11 = smov 0   ;;  %s831_s12 = smov 0  }
   0x6   :  { %s833_s13 = smov 0   ;;  %s835_s14 = smov 0  }
   0x7 LB: > { %s535_s15 = sadd.s32 4294967295, %s797_s14   ;;  %s536_s16 = sadd.s32 4294967294, %s797_s14   ;;  %s797_s14 = sphi %s835_s14, %s19_s14   ;;  %s793_s13 = sphi %s833_s13, %s1081_s13   ;;  %s789_s12 = sphi %s831_s12, %s1080_s12   ;;  %s785_s11 = sphi %s829_s11, %s1079_s11   ;;  %s781_s10 = sphi %s827_s10, %s1078_s10   ;;  %s777_s9 = sphi %s825_s9, %s1077_s9  }
   0x8   : > { %p53_p0 = scmp.ne.s32.totalorder %s781_s10, %s777_s9  ;;  %p859_p1 = scmp.eq.s32.totalorder %s535_s15, 0 }
   0x9   : > { %p863_p2 = scmp.eq.s32.totalorder %s535_s15, 1  ;;  %p104_p3 = scmp.eq.s32.totalorder %s536_s16, 1 }
   0xa   : > { %s1062_s17 = scalar_select %p859_p1, 1, 0 }
   0xb   : > { %s1063_s18 = scalar_select %p863_p2, 1, 0 }
   0xc   : > { %p869_p4 = por %p859_p1, %p53_p0  ;;  %p537_p5 = scmp.ge.s32.totalorder %s797_s14, 1 }
   0xd   : > { %p874_p6 = por %p104_p3, %p53_p0  ;;  %p111_p7 = scmp.lt.s32.totalorder %s797_s14, 3 }
   0xe   : > { %s1064_s19 = scalar_select %p869_p4, 1, 0 }
   0xf   : > { %s1065_s20 = scalar_select %p874_p6, 1, 0 }
  0x10   : > { %p879_p8 = pnand %p537_p5, %p111_p7  ;;  %s799_s22 = smov [#allocation7]  }
  0x11   : > { %s123_s23 = sshll.u32 %s799_s22, 4  ;;  %s31_s25 = sadd.s32 1, %s793_s13  ;;  %s124_s23 = int_to_ptr.vmem [resolvable:$true] %s123_s23 }
  0x12   : > { %s1066_s21 = scalar_select %p879_p8, 1, 0 }
  0x13   : > { %p569_p9 = pneg %p879_p8  ;;  %s653_s28 = scalar_lea.hbm %s1056_s1, 128 }
  0x14   : > { %p654_p12 = scmp.ne.s32.totalorder %s1056_s1, %s653_s28  ;;  %p660_p5 = scmp.lt.u32.totalorder %s653_s28, %s1056_s1 }
  0x15   : > { %p888_p11 = pnand %p569_p9, %p859_p1 }
  0x17   : > { %p655_p13 = pneg %p888_p11 }
  0x19   : > { %p656_p0 = pnand %p655_p13, %p654_p12 }
  0x1b   : > { %p657_p3 = pneg %p656_p0 }
  0x1d   : > { %p662_p7 = pnand %p660_p5, %p657_p3 }
  0x1f   : > { %665 = shalt.err (!%p662_p7)
}
  0x20   : > { %s666_s5 = scalar_lea.vmem %s124_s23, 128  ;;  %p674_p1 = scmp.lt.s32.totalorder %s124_s23, %s124_s23 }
  0x21   : > { %p667_p9 = scmp.ne.s32.totalorder %s124_s23, %s666_s5  ;;  %p675_p4 = scmp.lt.s32.totalorder %s666_s5, %s666_s5 }
  0x23   : > { %p669_p10 = pnand %p667_p9, %p655_p13  ;;  %p676_p8 = por %p675_p4, %p674_p1 }
  0x25   : > { %p670_p6 = pneg %p669_p10 }
  0x27   : > { %p677_p2 = pnand %p676_p8, %p670_p6 }
  0x29   : > { %680 = shalt.err (!%p677_p2)
}
  0x2a   : > { %s800_s6 = smov 64   ;;  %s801_s7 = smov 4  }
  0x2b   : > { %572 = dma.hbm_to_vmem [thread:$0]  (!%p888_p11), %s1056_s1, 128, %s124_s23, [#allocation8], %s800_s6, %s800_s6, %s801_s7  }
  0x2c   : > { %p33_p1 = scmp.ge.s32.totalorder %s31_s25, 2  ;;  %s40_s16 = sadd.s32 1, %s785_s11 }
  0x2d   : > { %p47_p2 = scmp.ne.s32.totalorder %s785_s11, %s781_s10  ;;  %p48_p4 = scmp.eq.s32.totalorder %s797_s14, 0 }
  0x2e   : > { %s1083_s25 = smov (%p33_p1, %s31_s25), 0  ;;  %p1069_p8 = scmp.ne.s32.totalorder %s1063_s18, 0 }
  0x2f   : > { %p915_p6 = por %p48_p4, %p47_p2  ;;  %s35_s24 = ssub.s32 %s793_s13, %s1083_s25 }
  0x30   : > { %p921_p10 = por %p1069_p8, %p47_p2  ;;  %p582_p12 = scmp.lt.s32.totalorder %s797_s14, 2 }
  0x31   : > { %p38_p11 = scmp.eq.s32.totalorder %s35_s24, 0  ;;  %s137_s23 = sand.u32 1, %s785_s11  }
  0x32   : > { %s540_s27 = sshll.u32 %s137_s23, 5  ;;  %s557_s29 = sshll.u32 %s793_s13, 9 }
  0x33   : > { %s930_s28 = scalar_select %p38_p11, %s785_s11, %s40_s16  }
  0x34   : > { %s936_s4 = scalar_lea.hbm %s1055_s0, %s557_s29  ;;  %s141_s18 = scalar_lea.vmem [#allocation4], %s540_s27 }
  0x35   : > { %s150_s5 = sshll.u32 %s141_s18, 4  ;;  %p942_p13 = pnand %p582_p12, %p915_p6  ;;  %s938_s5 = int_to_ptr.vmem [resolvable:$true] %s150_s5 }
  0x36   : > { %s946_s7 = scalar_lea.sflag [#allocation5], %s137_s23  ;;  %s681_s8 = scalar_lea.hbm %s936_s4, 512 }
  0x37   : > { %p682_p0 = scmp.ne.s32.totalorder %s936_s4, %s681_s8  ;;  %p683_p3 = pneg %p942_p13 }
  0x38   : > { %s686_s22 = scalar_lea.hbm %s1055_s0, 1024  ;;  %p687_p9 = scmp.lt.u32.totalorder %s936_s4, %s1055_s0 }
  0x39   : > { %p684_p5 = pnand %p683_p3, %p682_p0  ;;  %p688_p1 = scmp.lt.u32.totalorder %s686_s22, %s681_s8 }
  0x3a   : > { %p690_p4 = scmp.lt.u32.totalorder %s681_s8, %s936_s4 }
  0x3b   : > { %p685_p7 = pneg %p684_p5  ;;  %p689_p2 = por %p688_p1, %p687_p9 }
  0x3d   : > { %p691_p6 = por %p690_p4, %p689_p2 }
  0x3f   : > { %p692_p8 = pnand %p691_p6, %p685_p7 }
  0x41   : > { %695 = shalt.err (!%p692_p8)
}
  0x42   : > { %s696_s23 = scalar_lea.vmem %s938_s5, 512  ;;  %s802_s29 = smov [#allocation4]  }
  0x43   : > { %p697_p12 = scmp.ne.s32.totalorder %s938_s5, %s696_s23  ;;  %s701_s30 = sshll.u32 %s802_s29, 4  ;;  %s702_s30 = int_to_ptr.vmem [resolvable:$false] %s701_s30 }
  0x44   : > { %s703_s3 = scalar_lea.vmem %s702_s30, 1024  ;;  %p704_p5 = scmp.lt.s32.totalorder %s938_s5, %s702_s30 }
  0x45   : > { %p699_p11 = pnand %p697_p12, %p683_p3  ;;  %p705_p9 = scmp.lt.s32.totalorder %s703_s3, %s696_s23 }
  0x47   : > { %p700_p0 = pneg %p699_p11  ;;  %p706_p1 = por %p705_p9, %p704_p5 }
  0x49   : > { %p707_p2 = pnand %p706_p1, %p700_p0 }
  0x4b   : > { %710 = shalt.err (!%p707_p2)
}
  0x4c   : > { %s803_s18 = smov 256   ;;  %s804_s8 = smov 16  }
  0x4d   : > { %576 = dma.hbm_to_vmem [thread:$0]  (!%p942_p13), %s936_s4, 512, %s938_s5, %s946_s7, %s803_s18, %s803_s18, %s804_s8  }
  0x4e   : > { %p1072_p3 = scmp.ne.s32.totalorder %s1066_s21, 0 }
  0x4f   : > { %s977_s15 = sand.u32 (!%p1072_p3), 1, %s781_s10   ;;  %p1073_p7 = scmp.ne.s32.totalorder (!%p1072_p3), %s1064_s19, 0 }
  0x50   : > { %162 = sbr.rel (%p1072_p3) target bundleno = 760 (0x2f8), region = 28  ;;  %s544_s16 = sshll.u32 (!%p1072_p3), %s977_s15, 5 }
  0x51   : > { %s165_s22 = scalar_lea.sflag (!%p1072_p3), [#allocation5], %s977_s15  ;;  %s168_s24 = scalar_lea.vmem (!%p1072_p3), [#allocation4], %s544_s16 }
  0x57   : > { %764 = dma.done.wait (%p1073_p7), %s165_s22, 512  }
  0x58   : > { %766 = vsyncadd (%p1073_p7), %s165_s22, 4294966784  ;;  %p1074_p4 = scmp.ne.s32.totalorder %s1062_s17, 0 }
  0x5a   : > { %768 = dma.done.wait (%p1074_p4), [#allocation8], 128  }
  0x5b   : > { %770 = vsyncadd (%p1074_p4), [#allocation8], 4294967168  ;;  %v805_v0 = vmov 0   ;;  %v644_v1 = vld [vmem:[#allocation7] sm:$0xff]   ;;  %v206_v2 = vld [vmem:[%s168_s24 + $0x8] sm:$0xff]  ;;  %vm199_vm0 = vcmask 130048  }
  0x5c   : > { %274 = vmatprep.mubr.bf16.mxu0 %v805_v0  ;;  %642 = vset.pattern.permute.xlu1 %v805_v0  ;;  %v208_v3 = vld [vmem:[%s168_s24 + $0x18] sm:$0xff]  ;;  %v205_v4 = vld [vmem:[%s168_s24] sm:$0xff]  ;;  %v207_v6 = vld [vmem:[%s168_s24 + $0x10] sm:$0xff]  ;;  %vm202_vm1 = vcmask 7168   ;;  %v806_v10 = vmov 0.0   ;;  %s546_s17 = sshll.u32 %s977_s15, 3 }
  0x5d   : > { %219 = vxpose.xlu0.c.b16.start.end [1/1] (short) (narrow) %v644_v1, 32  ;;  %v210_v5 = vpack.c.bf16 %v208_v3, %v206_v2  ;;  %v209_v7 = vpack.c.bf16 %v207_v6, %v205_v4  ;;  %204 = vst.msk [vmem:[#allocation3 + $0x8] sm:$0xff] %vm202_vm1, %v806_v10  ;;  %203 = vst.msk [vmem:[#allocation3] sm:$0xff] %vm202_vm1, %v806_v10  ;;  %s192_s19 = scalar_lea.vmem [#allocation9], %s546_s17  ;;  %s560_s4 = sshll.u32 %s789_s12, 7  ;;  %vm424_vm4 = vcmask 125952  }
  0x5e   : > { %200 = vst.msk [vmem:[#allocation2] sm:$0xff] %vm199_vm0, %v806_v10  ;;  %201 = vst.msk [vmem:[#allocation2 + $0x8] sm:$0xff] %vm199_vm0, %v806_v10  ;;  %s441_s21 = sshll.u32 %s192_s19, 4  ;;  %s1004_s7 = scalar_lea.hbm %s1057_s2, %s560_s4  ;;  %s1006_s21 = int_to_ptr.vmem [resolvable:$true] %s441_s21 }
  0x5f   : > { %242 = vmatprep.subr.bf16.mxu0 %v210_v5  ;;  %s428_s12 = scalar_lea.sflag [#allocation6], %s977_s15  ;;  %s711_s27 = scalar_lea.vmem %s1006_s21, 128 }
  0x60   : > { %243 = vmatpush1.bf16.msra.mxu0 %v209_v7  ;;  %p712_p13 = scmp.ne.s32.totalorder %s1006_s21, %s711_s27  ;;  %s807_s23 = smov [#allocation9]  }
  0x61   : > { %s715_s29 = sshll.u32 %s807_s23, 4  ;;  %s716_s29 = int_to_ptr.vmem [resolvable:$false] %s715_s29 }
  0x62   : > { %p713_p6 = pnand %p712_p13, %p921_p10  ;;  %s717_s30 = scalar_lea.vmem %s716_s29, 256 }
  0x63   : > { %p718_p12 = scmp.lt.s32.totalorder %s1006_s21, %s716_s29  ;;  %p719_p11 = scmp.lt.s32.totalorder %s717_s30, %s711_s27 }
  0x64   : > { %v322_v55 = vld [vmem:[#allocation3 + $0x8] sm:$0xff]  ;;  %v321_v56 = vld [vmem:[#allocation3] sm:$0xff]  ;;  %p714_p8 = pneg %p713_p6 }
  0x65   : > { %v338_v5 = vld [vmem:[#allocation2] sm:$0xff]  ;;  %v339_v7 = vld [vmem:[#allocation2 + $0x8] sm:$0xff]  ;;  %p720_p0 = por %p719_p11, %p718_p12 }
  0x66   : > { %643 = vset.pattern.permute.xlu0 %v805_v0 }
  0x67   : > { %p721_p5 = pnand %p720_p0, %p714_p8 }
  0xc3   : > { %v227_v8 = vpop.trf.xlu0 }
  0xc4   : > { %548 = vmatmul.mubr.msk.bf16.vlgmr.msra.gmra.mrb[0].mxu0 %vm199_vm0, %v227_v8 }
  0xc5   : > { %284 = vmatprep.mubr.bf16.mxu0 %v805_v0 }
  0xc7   : > { %v228_v9 = vpop.trf.xlu0 }
  0xcc   : > { %549 = vmatmul.mubr.msk.bf16.gmra.mrb[4].mxu0 %vm199_vm0, %v228_v9 }
 0x197   : > { %v276_v11 = vpop.f32.mrb[0].mxu0 }
 0x198   : > { %v278_v12 = vpop.f32.mrb[1].mxu0  ;;  %v295_v14 = vmul.f32 %v276_v11, %v276_v11 }
 0x199   : > { %v280_v13 = vpop.f32.mrb[2].mxu0  ;;  %v296_v17 = vmul.f32 %v278_v12, %v278_v12 }
 0x19a   : > { %v297_v15 = vmul.f32 %v280_v13, %v280_v13  ;;  %v282_v16 = vpop.f32.mrb[3].mxu0 }
 0x19b   : > { %v298_v18 = vmul.f32 %v282_v16, %v282_v16 }
 0x19c   : > { %v299_v19 = vadd.f32 %v297_v15, %v295_v14 }
 0x19d   : > { %v306_v20 = vadd.f32 %v298_v18, %v296_v17 }
 0x19e   : > { %v300_v21 = vrot.slane %v299_v19, 4 }
 0x19f   : > { %v307_v22 = vrot.slane %v306_v20, 4  ;;  %v286_v23 = vpop.f32.mrb[4].mxu0 }
 0x1a0   : > { %v301_v24 = vadd.f32 %v300_v21, %v299_v19  ;;  %v288_v25 = vpop.f32.mrb[5].mxu0 }
 0x1a1   : > { %v308_v26 = vadd.f32 %v307_v22, %v306_v20  ;;  %v290_v27 = vpop.f32.mrb[6].mxu0 }
 0x1a2   : > { %v302_v28 = vrot.slane %v301_v24, 2  ;;  %v342_v29 = vpack.c.bf16 %v290_v27, %v286_v23  ;;  %v292_v30 = vpop.f32.mrb[7].mxu0 }
 0x1a3   : > { %v309_v31 = vrot.slane %v308_v26, 2  ;;  %v343_v32 = vpack.c.bf16 %v292_v30, %v288_v25 }
 0x1a4   : > { %v303_v33 = vadd.f32 %v302_v28, %v301_v24 }
 0x1a5   : > { %v310_v34 = vadd.f32 %v309_v31, %v308_v26  ;;  %344 = vmatprep.subr.bf16.mxu1 %v343_v32 }
 0x1a6   : > { %v304_v35 = vrot.slane %v303_v33, 1  ;;  %345 = vmatpush1.bf16.xpose.msra.mxu1 %v342_v29 }
 0x1a7   : > { %v311_v36 = vrot.slane %v310_v34, 1 }
 0x1a8   : > { %v305_v37 = vadd.f32 %v304_v35, %v303_v33 }
 0x1a9   : > { %v312_v38 = vadd.f32 %v311_v36, %v310_v34 }
 0x1aa   : > { %v313_v39 = vadd.f32 1e-07, %v305_v37 }
 0x1ab   : > { %v314_v40 = vadd.f32 1e-07, %v312_v38 }
 0x1ac   : > { %645 = vrcp.f32 %v313_v39 }
 0x1ad   : > { %647 = vrcp.f32 %v314_v40 }
 0x1b6   : > { %v646_v41 = vpop.eup %645 }
 0x1b7   : > { %v648_v42 = vpop.eup %647  ;;  %v319_v43 = vmul.f32 %v646_v41, %v297_v15  ;;  %v317_v44 = vmul.f32 %v646_v41, %v295_v14 }
 0x1b8   : > { %v318_v45 = vmul.f32 %v648_v42, %v296_v17  ;;  %v320_v46 = vmul.f32 %v648_v42, %v298_v18 }
 0x1b9   : > { %v340_v47 = vpack.c.bf16 %v319_v43, %v317_v44  ;;  %v325_v48 = vmul.f32 %v319_v43, %v319_v43  ;;  %v323_v49 = vmul.f32 %v317_v44, %v317_v44 }
 0x1ba   : > { %v341_v50 = vpack.c.bf16 %v320_v46, %v318_v45  ;;  %v326_v51 = vmul.f32 %v320_v46, %v320_v46  ;;  %v324_v52 = vmul.f32 %v318_v45, %v318_v45 }
 0x1bc   : > { %376 = vmatprep.mubr.bf16.mxu1 %v341_v50  ;;  %v330_v53 = vadd.f32 %v326_v51, %v325_v48  ;;  %v327_v54 = vadd.f32 %v324_v52, %v323_v49 }
 0x1bd   : > { %377 = vmatmul.mubr.bf16.vlgmr.msra.gmra.mrb[0].mxu1 %v340_v47 }
 0x1be   : > { %331 = vadd.xlane.f32.xlu1 %v330_v53  ;;  %328 = vadd.xlane.f32.xlu0 %v327_v54 }
 0x24b   : > { %v332_v57 = vpop.xlane.xlu1 %331  ;;  %v329_v58 = vpop.xlane.xlu0 %328 }
 0x24c   : > { %v334_v59 = vadd.f32 %v332_v57, %v322_v55  ;;  %v333_v60 = vadd.f32 %v329_v58, %v321_v56 }
 0x24e   : > { %337 = vst.msk [vmem:[#allocation3 + $0x8] sm:$0xff] %vm202_vm1, %v334_v59  ;;  %336 = vst.msk [vmem:[#allocation3] sm:$0xff] %vm202_vm1, %v333_v60 }
 0x255   : > { %v393_v61 = vld [vmem:[#allocation3 + $0x8] sm:$0xff]  ;;  %v392_v62 = vld [vmem:[#allocation3] sm:$0xff] }
 0x256   : > { %649 = vrsqrt.f32 %v393_v61  ;;  %vm395_vm2 = vcmp.gt.f32.partialorder %v393_v61, 0.0  ;;  %vm394_vm3 = vcmp.gt.f32.partialorder %v392_v62, 0.0 }
 0x257   : > { %651 = vrsqrt.f32 %v392_v62 }
 0x260   : > { %v650_v63 = vpop.eup %649 }
 0x261   : > { %v652_v0 = vpop.eup %651  ;;  %v399_v1 = vsel %vm395_vm2, %v650_v63, 0.0 }
 0x262   : > { %v403_v2 = vmul.f32 0.0625, %v399_v1  ;;  %v398_v3 = vsel %vm394_vm3, %v652_v0, 0.0 }
 0x263   : > { %v402_v4 = vmul.f32 0.0625, %v398_v3 }
 0x264   : > { %411 = vperm.xlu0 %643, %v403_v2  }
 0x265   : > { %406 = vperm.xlu1 %642, %v402_v4  }
 0x290   : > { %v378_v6 = vpop.f32.mrb[0].mxu1 }
 0x291   : > { %v385_v8 = vadd.f32 %v378_v6, %v338_v5  ;;  %v380_v9 = vpop.f32.mrb[1].mxu1 }
 0x292   : > { %v381_v10 = vpop.f32.mrb[2].mxu1 }
 0x293   : > { %387 = vst.msk [vmem:[#allocation2] sm:$0xff] %vm199_vm0, %v385_v8  ;;  %v386_v11 = vadd.f32 %v381_v10, %v339_v7  ;;  %v383_v12 = vpop.f32.mrb[3].mxu1 }
 0x295   : > { %388 = vst.msk [vmem:[#allocation2 + $0x8] sm:$0xff] %vm199_vm0, %v386_v11 }
 0x29a   : > { %v400_v17 = vld [vmem:[#allocation2] sm:$0xff] }
 0x29c   : > { %v401_v14 = vld [vmem:[#allocation2 + $0x8] sm:$0xff] }
 0x2e3   : > { %v412_v13 = vpop.permute.xlu0 %411 }
 0x2e4   : > { %v415_v15 = vmul.f32 %v412_v13, %v401_v14  ;;  %v407_v16 = vpop.permute.xlu1 %406 }
 0x2e5   : > { %v414_v18 = vmul.f32 %v407_v16, %v400_v17 }
 0x2e6   : > { %v559_v19 = vpack.c.bf16 %v415_v15, %v415_v15 }
 0x2e7   : > { %v558_v20 = vpack.c.bf16 %v414_v18, %v414_v18 }
 0x2e8   : > { %426 = vst.msk [vmem:[%s192_s19 + $0x4] sm:$0xf] %vm424_vm4, %v559_v19 }
 0x2e9   : > { %425 = vst.msk [vmem:[%s192_s19] sm:$0xf] %vm424_vm4, %v558_v20 }
 0x2ea   : > { %724 = shalt.err (!%p721_p5)
}
 0x2eb   : > { %s725_s3 = scalar_lea.hbm %s1004_s7, 128  ;;  %s729_s16 = scalar_lea.hbm %s1057_s2, 256 }
 0x2ec   : > { %p726_p9 = scmp.ne.s32.totalorder %s1004_s7, %s725_s3  ;;  %p730_p3 = scmp.lt.u32.totalorder %s1004_s7, %s1057_s2 }
 0x2ed   : > { %p731_p7 = scmp.lt.u32.totalorder %s729_s16, %s725_s3  ;;  %p733_p13 = scmp.lt.u32.totalorder %s725_s3, %s1004_s7 }
 0x2ee   : > { %p727_p1 = pnand %p726_p9, %p921_p10 }
 0x2ef   : > { %p732_p4 = por %p731_p7, %p730_p3 }
 0x2f0   : > { %p728_p2 = pneg %p727_p1 }
 0x2f1   : > { %p734_p6 = por %p733_p13, %p732_p4 }
 0x2f3   : > { %p735_p8 = pnand %p734_p6, %p728_p2 }
 0x2f5   : > { %738 = shalt.err (!%p735_p8)
}
 0x2f6   : > { %s808_s17 = smov 64   ;;  %s809_s19 = smov 4  }
 0x2f7   : > { %567 = dma.vmem_to_hbm [thread:$0]  (%p921_p10), %s1006_s21, 128, %s1004_s7, %s428_s12, %s808_s17, %s808_s17, %s809_s19  }
 0x2f8 PF: > { %s456_s4 = sand.u32 1, %s777_s9   ;;  %p1075_p12 = scmp.ne.s32.totalorder %s1065_s20, 0 }
 0x2f9   : > { %p1076_p11 = scmp.ge.s32.totalorder %s797_s14, 2  ;;  %s457_s5 = scalar_lea.sflag [#allocation6], %s456_s4 }
 0x2fb   : > { %p578_p0 = pnand %p1076_p11, %p1075_p12 }
 0x2fd   : > { %772 = dma.done.wait (!%p578_p0), %s457_s5, 128  }
 0x2fe   : > { %774 = vsyncadd (!%p578_p0), %s457_s5, 4294967168  ;;  %s19_s14 = sadd.s32 1, %s797_s14   ;;  %s1077_s9 = smov %s781_s10 }
 0x2ff   : > { %p16_p5 = scmp.ge.s32.totalorder %s19_s14, 4   ;;  %s1078_s10 = smov %s785_s11 }
 0x300   : > { %s1079_s11 = smov %s930_s28  ;;  %s1080_s12 = smov %s793_s13 }
 0x301   : > { %s1081_s13 = smov %s1083_s25  ;;  %18 = sbr.rel (!%p16_p5) target bundleno = 7 (0x7), region = 85 }
 0x308   :  { %462 = vsyncpa [#allocation5], 1 }
 0x309   :  { %464 = vsyncpa [#allocation5 + $0x1], 1 }
 0x30a   :  { %465 = vsyncpa [#allocation8], 1 }
 0x30b   :  { %466 = vsyncpa [#allocation6], 1 }
 0x30c   :  { %468 = vsyncpa [#allocation6 + $0x1], 1 }

</bundles_post_ra>
